<compile_context>
chip_gen: v7x
topology: tpu7x:2x2x1
jax: 0.10.0
libtpu: 0.0.40
codegen_flags: <defaults>
</compile_context>

<pallas_src>
import re

import jax
import jax.numpy as jnp
from jax.experimental import pallas as pl
from jax.experimental.pallas import tpu as pltpu

INPUT_DIM = 2
TIME_DIM = 1
HIDDEN_DIM = 128
OUTPUT_DIM = INPUT_DIM            # output_dim defaults to input_dim
OUT_PAD = 8                       # padded output feature width (2 real outputs)


def _round_up(v, m):
    return ((v + m - 1) // m) * m


def _device_tiling():
    """Best-effort device detection for tile sizing (perf-only; safe fallback)."""
    kind = ""
    try:
        kind = jax.devices()[0].device_kind.lower()
    except Exception:
        pass
    m = re.search(r"(\d+)", kind)
    gen = int(m.group(1)) if m else 0
    # 2 TensorCores visible per device: v4 / v5p megacore and v7x.
    cores = 2 if (gen == 4 or gen >= 7 or kind.rstrip().endswith("p")) else 1
    # v5e-class chips default to a 16 MiB scoped-VMEM limit -> cap TM at 2048.
    max_tm = 4096 if gen >= 6 else 2048
    return cores, max_tm


def _choose_tm(n, cores, max_tm):
    """Row tile: as big as allowed, step count a multiple of `cores`, tiny tail."""
    n8 = _round_up(max(int(n), 1), 8)
    steps = -(-n8 // max_tm)                       # ceil-div
    if cores > 1:
        steps = _round_up(max(steps, cores), cores)
    tm = _round_up(-(-n8 // steps), 8)
    return min(max_tm, tm)


def _mlp_kernel(x_ref, t_ref, w1_ref, b1_ref, w2_ref, b2_ref,
                w3_ref, b3_ref, w4_ref, b4_ref, o_ref):
    """4-layer MLP on one (TM, 2)+(TM, 1) row tile. Weights fully resident."""
    x = x_ref[...]                       # (TM, 2) f32
    tt = t_ref[...]                      # (TM, 1) f32
    w1 = w1_ref[...]                     # (3, 128) f32

    # Layer 1: only 3 real input features -> broadcast FMAs on the VPU
    # (free filler under the MXU matmuls) instead of a padded matmul.
    a1 = (x[:, 0:1] * w1[0:1, :]
          + x[:, 1:2] * w1[1:2, :]
          + tt * w1[2:3, :]
          + b1_ref[...])                 # (TM, 128) f32
    a1 = jnp.maximum(a1, 0.0).astype(jnp.bfloat16)

    # Layers 2-4: bf16 operands, f32 accumulation on the MXU.
    a2 = jnp.dot(a1, w2_ref[...], preferred_element_type=jnp.float32) + b2_ref[...]
    a2 = jnp.maximum(a2, 0.0).astype(jnp.bfloat16)

    a3 = jnp.dot(a2, w3_ref[...], preferred_element_type=jnp.float32) + b3_ref[...]
    a3 = jnp.maximum(a3, 0.0).astype(jnp.bfloat16)

    out = jnp.dot(a3, w4_ref[...], preferred_element_type=jnp.float32) + b4_ref[...]
    o_ref[...] = out.astype(o_ref.dtype)          # narrow (TM, 8) store


@jax.jit
def mlp_forward(x, t, params):
    """Mirrors MLP.forward(x, t). Returns (N, OUTPUT_DIM) in f32."""
    # ---- glue (plain JAX): reshape / broadcast / row padding only ----
    x2 = x.reshape(-1, INPUT_DIM).astype(jnp.float32)                  # (N, 2)
    n = x2.shape[0]
    t2 = t.reshape(-1, TIME_DIM).astype(jnp.float32).reshape(-1, 1)
    t2 = jnp.broadcast_to(t2, (n, 1))                                  # (N, 1)

    cores, max_tm = _device_tiling()
    tm = _choose_tm(n, cores, max_tm)
    n_pad = _round_up(n, tm)
    pad = n_pad - n

    xp = jnp.pad(x2, ((0, pad), (0, 0)))                               # (n_pad, 2)
    tp = jnp.pad(t2, ((0, pad), (0, 0)))                               # (n_pad, 1)

    (w1, b1), (w2, b2), (w3, b3), (w4, b4) = params
    # PyTorch Linear: y = x @ W.T + b ; W is (out, in).
    w1p = w1.T.astype(jnp.float32)                                     # (3, 128)
    b1p = b1.reshape(1, HIDDEN_DIM).astype(jnp.float32)
    w2p = w2.T.astype(jnp.bfloat16)                                    # (128, 128)
    b2p = b2.reshape(1, HIDDEN_DIM).astype(jnp.float32)
    w3p = w3.T.astype(jnp.bfloat16)                                    # (128, 128)
    b3p = b3.reshape(1, HIDDEN_DIM).astype(jnp.float32)
    w4p = jnp.zeros((HIDDEN_DIM, OUT_PAD), jnp.float32)
    w4p = w4p.at[:, :OUTPUT_DIM].set(w4.T).astype(jnp.bfloat16)        # (128, 8)
    b4p = jnp.zeros((1, OUT_PAD), jnp.float32).at[0, :OUTPUT_DIM].set(b4)

    grid = (n_pad // tm,)
    x_spec = pl.BlockSpec((tm, INPUT_DIM), lambda i: (i, 0))
    t_spec = pl.BlockSpec((tm, 1), lambda i: (i, 0))
    out_spec = pl.BlockSpec((tm, OUT_PAD), lambda i: (i, 0))

    def full(r, c):
        return pl.BlockSpec((r, c), lambda i: (0, 0))

    # Advisory cost: real payload only.
    flops = 2 * n_pad * ((INPUT_DIM + TIME_DIM) * HIDDEN_DIM
                         + 2 * HIDDEN_DIM * HIDDEN_DIM
                         + HIDDEN_DIM * OUT_PAD)
    bytes_accessed = (4 * n_pad * (INPUT_DIM + 1 + OUT_PAD)
                      + 4 * (INPUT_DIM + TIME_DIM) * HIDDEN_DIM
                      + 2 * (2 * HIDDEN_DIM * HIDDEN_DIM + HIDDEN_DIM * OUT_PAD)
                      + 4 * (3 * HIDDEN_DIM + OUT_PAD))

    out_pad = pl.pallas_call(
        _mlp_kernel,
        out_shape=jax.ShapeDtypeStruct((n_pad, OUT_PAD), jnp.float32),
        grid_spec=pltpu.PrefetchScalarGridSpec(
            num_scalar_prefetch=0,
            grid=grid,
            in_specs=[x_spec, t_spec,
                      full(INPUT_DIM + TIME_DIM, HIDDEN_DIM), full(1, HIDDEN_DIM),
                      full(HIDDEN_DIM, HIDDEN_DIM), full(1, HIDDEN_DIM),
                      full(HIDDEN_DIM, HIDDEN_DIM), full(1, HIDDEN_DIM),
                      full(HIDDEN_DIM, OUT_PAD), full(1, OUT_PAD)],
            out_specs=out_spec,
        ),
        compiler_params=pltpu.CompilerParams(
            dimension_semantics=("parallel",)),
        cost_estimate=pl.CostEstimate(
            flops=int(flops), transcendentals=0,
            bytes_accessed=int(bytes_accessed)),
    )(xp, tp, w1p, b1p, w2p, b2p, w3p, b3p, w4p, b4p)

    return out_pad[:n, :OUTPUT_DIM]


def init_params(key):
    """Deterministic init matching nn.Linear shapes (out, in) and (out,)."""
    dims = [(HIDDEN_DIM, INPUT_DIM + TIME_DIM),
            (HIDDEN_DIM, HIDDEN_DIM),
            (HIDDEN_DIM, HIDDEN_DIM),
            (OUTPUT_DIM, HIDDEN_DIM)]
    params = []
    for (out_d, in_d) in dims:
        key, kw, kb = jax.random.split(key, 3)
        bound = 1.0 / (in_d ** 0.5)
        w = jax.random.uniform(kw, (out_d, in_d), jnp.float32, -bound, bound)
        b = jax.random.uniform(kb, (out_d,), jnp.float32, -bound, bound)
        params.append((w, b))
    return params


def _reference_f32(x, t, params):
    """Pure-JAX full-f32 reference of the same forward pass."""
    x2 = x.reshape(-1, INPUT_DIM).astype(jnp.float32)
    n = x2.shape[0]
    t2 = jnp.broadcast_to(
        t.reshape(-1, TIME_DIM).astype(jnp.float32).reshape(-1, 1), (n, 1))
    h = jnp.concatenate([x2, t2], axis=1)
    (w1, b1), (w2, b2), (w3, b3), (w4, b4) = params
    h = jnp.maximum(h @ w1.T + b1, 0.0)
    h = jnp.maximum(h @ w2.T + b2, 0.0)
    h = jnp.maximum(h @ w3.T + b3, 0.0)
    return h @ w4.T + b4


def _reference_mixed(x, t, params):
    """Pure-JAX reference mirroring the kernel's mixed precision exactly."""
    x2 = x.reshape(-1, INPUT_DIM).astype(jnp.float32)
    n = x2.shape[0]
    t2 = jnp.broadcast_to(
        t.reshape(-1, TIME_DIM).astype(jnp.float32).reshape(-1, 1), (n, 1))
    (w1, b1), (w2, b2), (w3, b3), (w4, b4) = params
    w1t = w1.T.astype(jnp.float32)
    a = (x2[:, 0:1] * w1t[0:1, :] + x2[:, 1:2] * w1t[1:2, :]
         + t2 * w1t[2:3, :] + b1.reshape(1, -1))
    a = jnp.maximum(a, 0.0).astype(jnp.bfloat16)
    a = jnp.dot(a, w2.T.astype(jnp.bfloat16),
                preferred_element_type=jnp.float32) + b2
    a = jnp.maximum(a, 0.0).astype(jnp.bfloat16)
    a = jnp.dot(a, w3.T.astype(jnp.bfloat16),
                preferred_element_type=jnp.float32) + b3
    a = jnp.maximum(a, 0.0).astype(jnp.bfloat16)
    return jnp.dot(a, w4.T.astype(jnp.bfloat16),
                   preferred_element_type=jnp.float32) + b4


if __name__ == "__main__":
    key = jax.random.PRNGKey(0)
    kp, kx, kt = jax.random.split(key, 3)

    params = init_params(kp)

    # x of shape (2, 64, 2) -> reshaped internally to (128, 2); t is a scalar time.
    x = jax.random.normal(kx, (2, 64, INPUT_DIM), jnp.float32)
    t = jax.random.uniform(kt, (1,), jnp.float32)

    out = mlp_forward(x, t, params)
    jax.block_until_ready(out)

    assert out.shape == (128, OUTPUT_DIM), out.shape

    ref_mixed = _reference_mixed(x, t, params)   # same bf16-operand numerics
    ref_f32 = _reference_f32(x, t, params)       # full-precision sanity check
    assert jnp.allclose(out, ref_mixed, atol=2e-3, rtol=2e-3), \
        "mismatch vs mixed-precision reference"
    assert jnp.allclose(out, ref_f32, atol=5e-2, rtol=5e-2), \
        "mismatch vs f32 reference"

    print("KERNEL_OK")
</pallas_src>

<mosaic_0001>
module attributes {stable_mosaic.version = 11 : i64} {
  func.func @_mlp_kernel(%arg0: i32, %arg1: memref<128x2xf32, #tpu.memory_space<vmem>>, %arg2: memref<128x1xf32, #tpu.memory_space<vmem>>, %arg3: memref<3x128xf32, #tpu.memory_space<vmem>>, %arg4: memref<1x128xf32, #tpu.memory_space<vmem>>, %arg5: memref<128x128xbf16, #tpu.memory_space<vmem>>, %arg6: memref<1x128xf32, #tpu.memory_space<vmem>>, %arg7: memref<128x128xbf16, #tpu.memory_space<vmem>>, %arg8: memref<1x128xf32, #tpu.memory_space<vmem>>, %arg9: memref<128x8xbf16, #tpu.memory_space<vmem>>, %arg10: memref<1x8xf32, #tpu.memory_space<vmem>>, %arg11: memref<128x8xf32, #tpu.memory_space<vmem>>) attributes {dimension_semantics = [#tpu.dimension_semantics<parallel>], iteration_bounds = array<i64: 1>, scalar_prefetch = 0 : i64, scratch_operands = 0 : i64, tpu.core_type = #tpu.core_type<tc>, window_params = [{transform_indices = @transform_0, window_bounds = array<i64: 128, 2>}, {transform_indices = @transform_1, window_bounds = array<i64: 128, 1>}, {pipeline_mode = #tpu.pipeline_mode<synchronous>, transform_indices = @transform_2, window_bounds = array<i64: 3, 128>}, {pipeline_mode = #tpu.pipeline_mode<synchronous>, transform_indices = @transform_3, window_bounds = array<i64: 1, 128>}, {pipeline_mode = #tpu.pipeline_mode<synchronous>, transform_indices = @transform_4, window_bounds = array<i64: 128, 128>}, {pipeline_mode = #tpu.pipeline_mode<synchronous>, transform_indices = @transform_5, window_bounds = array<i64: 1, 128>}, {pipeline_mode = #tpu.pipeline_mode<synchronous>, transform_indices = @transform_6, window_bounds = array<i64: 128, 128>}, {pipeline_mode = #tpu.pipeline_mode<synchronous>, transform_indices = @transform_7, window_bounds = array<i64: 1, 128>}, {pipeline_mode = #tpu.pipeline_mode<synchronous>, transform_indices = @transform_8, window_bounds = array<i64: 128, 8>}, {pipeline_mode = #tpu.pipeline_mode<synchronous>, transform_indices = @transform_9, window_bounds = array<i64: 1, 8>}, {transform_indices = @transform_10, window_bounds = array<i64: 128, 8>}]} {
    %c0 = arith.constant 0 : index
    %c0_0 = arith.constant 0 : index
    %0 = vector.load %arg1[%c0, %c0_0] : memref<128x2xf32, #tpu.memory_space<vmem>>, vector<128x2xf32>
    %c0_1 = arith.constant 0 : index
    %c0_2 = arith.constant 0 : index
    %1 = vector.load %arg2[%c0_1, %c0_2] : memref<128x1xf32, #tpu.memory_space<vmem>>, vector<128x1xf32>
    %c0_3 = arith.constant 0 : index
    %c0_4 = arith.constant 0 : index
    %2 = vector.load %arg3[%c0_3, %c0_4] : memref<3x128xf32, #tpu.memory_space<vmem>>, vector<3x128xf32>
    %3 = vector.extract_strided_slice %0 {offsets = [0, 0], sizes = [128, 1], strides = [1, 1]} : vector<128x2xf32> to vector<128x1xf32>
    %4 = vector.extract_strided_slice %2 {offsets = [0, 0], sizes = [1, 128], strides = [1, 1]} : vector<3x128xf32> to vector<1x128xf32>
    %5 = vector.broadcast %3 : vector<128x1xf32> to vector<128x128xf32>
    %6 = vector.broadcast %4 : vector<1x128xf32> to vector<128x128xf32>
    %7 = arith.mulf %5, %6 : vector<128x128xf32>
    %8 = vector.extract_strided_slice %0 {offsets = [0, 1], sizes = [128, 1], strides = [1, 1]} : vector<128x2xf32> to vector<128x1xf32>
    %9 = vector.extract_strided_slice %2 {offsets = [1, 0], sizes = [1, 128], strides = [1, 1]} : vector<3x128xf32> to vector<1x128xf32>
    %10 = vector.broadcast %8 : vector<128x1xf32> to vector<128x128xf32>
    %11 = vector.broadcast %9 : vector<1x128xf32> to vector<128x128xf32>
    %12 = arith.mulf %10, %11 : vector<128x128xf32>
    %13 = arith.addf %7, %12 : vector<128x128xf32>
    %14 = vector.extract_strided_slice %2 {offsets = [2, 0], sizes = [1, 128], strides = [1, 1]} : vector<3x128xf32> to vector<1x128xf32>
    %15 = vector.broadcast %1 : vector<128x1xf32> to vector<128x128xf32>
    %16 = vector.broadcast %14 : vector<1x128xf32> to vector<128x128xf32>
    %17 = arith.mulf %15, %16 : vector<128x128xf32>
    %18 = arith.addf %13, %17 : vector<128x128xf32>
    %c0_5 = arith.constant 0 : index
    %c0_6 = arith.constant 0 : index
    %19 = vector.load %arg4[%c0_5, %c0_6] : memref<1x128xf32, #tpu.memory_space<vmem>>, vector<1x128xf32>
    %20 = vector.broadcast %19 : vector<1x128xf32> to vector<128x128xf32>
    %21 = arith.addf %18, %20 : vector<128x128xf32>
    %cst = arith.constant 0.000000e+00 : f32
    %22 = vector.broadcast %cst : f32 to vector<128x128xf32>
    %23 = arith.maximumf %21, %22 : vector<128x128xf32>
    %24 = arith.truncf %23 : vector<128x128xf32> to vector<128x128xbf16>
    %c0_7 = arith.constant 0 : index
    %c0_8 = arith.constant 0 : index
    %25 = vector.load %arg5[%c0_7, %c0_8] : memref<128x128xbf16, #tpu.memory_space<vmem>>, vector<128x128xbf16>
    %cst_9 = arith.constant dense<0.000000e+00> : vector<128x128xf32>
    %26 = tpu.matmul %24, %25, %cst_9 {dimension_numbers = #tpu.dot_dimension_numbers<[1], [0], [0], [1], [0, 0, 1, 1], [], []>} : vector<128x128xbf16>, vector<128x128xbf16>, vector<128x128xf32> -> vector<128x128xf32>
    %c0_10 = arith.constant 0 : index
    %c0_11 = arith.constant 0 : index
    %27 = vector.load %arg6[%c0_10, %c0_11] : memref<1x128xf32, #tpu.memory_space<vmem>>, vector<1x128xf32>
    %28 = vector.broadcast %27 : vector<1x128xf32> to vector<128x128xf32>
    %29 = arith.addf %26, %28 : vector<128x128xf32>
    %cst_12 = arith.constant 0.000000e+00 : f32
    %30 = vector.broadcast %cst_12 : f32 to vector<128x128xf32>
    %31 = arith.maximumf %29, %30 : vector<128x128xf32>
    %32 = arith.truncf %31 : vector<128x128xf32> to vector<128x128xbf16>
    %c0_13 = arith.constant 0 : index
    %c0_14 = arith.constant 0 : index
    %33 = vector.load %arg7[%c0_13, %c0_14] : memref<128x128xbf16, #tpu.memory_space<vmem>>, vector<128x128xbf16>
    %cst_15 = arith.constant dense<0.000000e+00> : vector<128x128xf32>
    %34 = tpu.matmul %32, %33, %cst_15 {dimension_numbers = #tpu.dot_dimension_numbers<[1], [0], [0], [1], [0, 0, 1, 1], [], []>} : vector<128x128xbf16>, vector<128x128xbf16>, vector<128x128xf32> -> vector<128x128xf32>
    %c0_16 = arith.constant 0 : index
    %c0_17 = arith.constant 0 : index
    %35 = vector.load %arg8[%c0_16, %c0_17] : memref<1x128xf32, #tpu.memory_space<vmem>>, vector<1x128xf32>
    %36 = vector.broadcast %35 : vector<1x128xf32> to vector<128x128xf32>
    %37 = arith.addf %34, %36 : vector<128x128xf32>
    %cst_18 = arith.constant 0.000000e+00 : f32
    %38 = vector.broadcast %cst_18 : f32 to vector<128x128xf32>
    %39 = arith.maximumf %37, %38 : vector<128x128xf32>
    %40 = arith.truncf %39 : vector<128x128xf32> to vector<128x128xbf16>
    %c0_19 = arith.constant 0 : index
    %c0_20 = arith.constant 0 : index
    %41 = vector.load %arg9[%c0_19, %c0_20] : memref<128x8xbf16, #tpu.memory_space<vmem>>, vector<128x8xbf16>
    %cst_21 = arith.constant dense<0.000000e+00> : vector<128x8xf32>
    %42 = tpu.matmul %40, %41, %cst_21 {dimension_numbers = #tpu.dot_dimension_numbers<[1], [0], [0], [1], [0, 0, 1, 1], [], []>} : vector<128x128xbf16>, vector<128x8xbf16>, vector<128x8xf32> -> vector<128x8xf32>
    %c0_22 = arith.constant 0 : index
    %c0_23 = arith.constant 0 : index
    %43 = vector.load %arg10[%c0_22, %c0_23] : memref<1x8xf32, #tpu.memory_space<vmem>>, vector<1x8xf32>
    %44 = vector.broadcast %43 : vector<1x8xf32> to vector<128x8xf32>
    %45 = arith.addf %42, %44 : vector<128x8xf32>
    %c0_24 = arith.constant 0 : index
    %c0_25 = arith.constant 0 : index
    %46 = vector.load %arg11[%c0_24, %c0_25] : memref<128x8xf32, #tpu.memory_space<vmem>>, vector<128x8xf32>
    tpu.vector_store %arg11[%c0_24, %c0_25], %45 {strides = array<i32>} : memref<128x8xf32, #tpu.memory_space<vmem>>, vector<128x8xf32>,
    return
  }
  func.func @transform_0(%arg0: i32) -> (i32, i32) {
    %c0_i32 = arith.constant 0 : i32
    %c0_i32_0 = arith.constant 0 : i32
    return %arg0, %c0_i32 : i32, i32
  }
  func.func @transform_1(%arg0: i32) -> (i32, i32) {
    %c0_i32 = arith.constant 0 : i32
    %c0_i32_0 = arith.constant 0 : i32
    return %arg0, %c0_i32 : i32, i32
  }
  func.func @transform_2(%arg0: i32) -> (i32, i32) {
    %c0_i32 = arith.constant 0 : i32
    %c0_i32_0 = arith.constant 0 : i32
    %c0_i32_1 = arith.constant 0 : i32
    return %c0_i32, %c0_i32_0 : i32, i32
  }
  func.func @transform_3(%arg0: i32) -> (i32, i32) {
    %c0_i32 = arith.constant 0 : i32
    %c0_i32_0 = arith.constant 0 : i32
    %c0_i32_1 = arith.constant 0 : i32
    return %c0_i32, %c0_i32_0 : i32, i32
  }
  func.func @transform_4(%arg0: i32) -> (i32, i32) {
    %c0_i32 = arith.constant 0 : i32
    %c0_i32_0 = arith.constant 0 : i32
    %c0_i32_1 = arith.constant 0 : i32
    return %c0_i32, %c0_i32_0 : i32, i32
  }
  func.func @transform_5(%arg0: i32) -> (i32, i32) {
    %c0_i32 = arith.constant 0 : i32
    %c0_i32_0 = arith.constant 0 : i32
    %c0_i32_1 = arith.constant 0 : i32
    return %c0_i32, %c0_i32_0 : i32, i32
  }
  func.func @transform_6(%arg0: i32) -> (i32, i32) {
    %c0_i32 = arith.constant 0 : i32
    %c0_i32_0 = arith.constant 0 : i32
    %c0_i32_1 = arith.constant 0 : i32
    return %c0_i32, %c0_i32_0 : i32, i32
  }
  func.func @transform_7(%arg0: i32) -> (i32, i32) {
    %c0_i32 = arith.constant 0 : i32
    %c0_i32_0 = arith.constant 0 : i32
    %c0_i32_1 = arith.constant 0 : i32
    return %c0_i32, %c0_i32_0 : i32, i32
  }
  func.func @transform_8(%arg0: i32) -> (i32, i32) {
    %c0_i32 = arith.constant 0 : i32
    %c0_i32_0 = arith.constant 0 : i32
    %c0_i32_1 = arith.constant 0 : i32
    return %c0_i32, %c0_i32_0 : i32, i32
  }
  func.func @transform_9(%arg0: i32) -> (i32, i32) {
    %c0_i32 = arith.constant 0 : i32
    %c0_i32_0 = arith.constant 0 : i32
    %c0_i32_1 = arith.constant 0 : i32
    return %c0_i32, %c0_i32_0 : i32, i32
  }
  func.func @transform_10(%arg0: i32) -> (i32, i32) {
    %c0_i32 = arith.constant 0 : i32
    %c0_i32_0 = arith.constant 0 : i32
    return %arg0, %c0_i32 : i32, i32
  }
}

</mosaic_0001>

<bundles_post_ra>
// kernel: mlp_forward.1
= control target key start
LH: loop header
LB: loop body
LE: loop exit
PB: predicated region body
PF: predicated region fallthrough
CT: control target
= control target key end

     0   :  { %v1237_v0 = vmov 1   ;;  %v1238_v7 = vmov 0   ;;  %v149_v46 = vlaneseq  ;;  %vm984_vm0 = vcmask 64512   ;;  %s1666_s0 = inlined_call_operand.vmem [shape: f32[128,2], index: 0, kind: input, shape index: {}]   ;;  %s1667_s4 = inlined_call_operand.vmem [shape: bf16[128,128], index: 4, kind: input, shape index: {}]   ;;  %s1668_s1 = inlined_call_operand.vmem [shape: f32[128,1], index: 1, kind: input, shape index: {}]   ;;  %s1669_s6 = inlined_call_operand.vmem [shape: bf16[128,128], index: 6, kind: input, shape index: {}]   ;;  %s1670_s2 = inlined_call_operand.vmem [shape: f32[3,128], index: 2, kind: input, shape index: {}]   ;;  %s1671_s3 = inlined_call_operand.vmem [shape: f32[1,128], index: 3, kind: input, shape index: {}]   ;;  %s1672_s8 = inlined_call_operand.vmem [shape: bf16[128,8], index: 8, kind: input, shape index: {}]   ;;  %s1673_s5 = inlined_call_operand.vmem [shape: f32[1,128], index: 5, kind: input, shape index: {}]   ;;  %s1674_s7 = inlined_call_operand.vmem [shape: f32[1,128], index: 7, kind: input, shape index: {}]   ;;  %s1675_s9 = inlined_call_operand.vmem [shape: f32[1,8], index: 9, kind: input, shape index: {}]   ;;  %s1676_s10 = inlined_call_operand.vmem [shape: f32[128,8], index: 10, kind: output, shape index: {}]  }
   0x1   :  { %1197 = vset.pattern.permute.xlu0 %v1237_v0  ;;  %1195 = vset.pattern.permute.xlu1 %v1237_v0  ;;  %v38_v1 = vld [vmem:[%s1666_s0 + $0x10] sm:$0xff]  ;;  %v36_v2 = vld [vmem:[%s1666_s0] sm:$0xff]  ;;  %v37_v4 = vld [vmem:[%s1666_s0 + $0x8] sm:$0xff] }
   0x2   :  { %178 = vperm.xlu0 %1197, %v38_v1   ;;  %170 = vperm.xlu1 %1195, %v36_v2   ;;  %v40_v3 = vld [vmem:[%s1666_s0 + $0x20] sm:$0xff]  ;;  %v39_v6 = vld [vmem:[%s1666_s0 + $0x18] sm:$0xff]  ;;  %v1214_v10 = vld [vmem:[%s1667_s4 + $0x8] sm:$0xff]   ;;  %v150_v51 = vshrl.u32 %v149_v46, 7 }
   0x3   :  { %v1311_v5 = vld [vmem:[%s1666_s0 + $0x40] sm:$0xff]  ;;  %v1215_v11 = vld [vmem:[%s1667_s4 + $0x10] sm:$0xff]   ;;  %v1216_v13 = vld [vmem:[%s1667_s4 + $0x18] sm:$0xff]  }
   0x4   :  { %v1321_v8 = vld [vmem:[%s1666_s0 + $0x60] sm:$0xff]  ;;  %v54_v14 = vld [vmem:[%s1668_s1 + $0x10] sm:$0xff]  ;;  %v55_v16 = vld [vmem:[%s1668_s1 + $0x18] sm:$0xff]  ;;  %v235_v54 = vsub.s32 1, %v150_v51  ;;  %v151_v55 = vsub.s32 0, %v150_v51  ;;  %v351_v59 = vsub.s32 2, %v150_v51 }
   0x5   :  { %v1213_v9 = vld [vmem:[%s1667_s4] sm:$0xff]   ;;  %v53_v17 = vld [vmem:[%s1668_s1 + $0x8] sm:$0xff]  ;;  %v1219_v20 = vld [vmem:[%s1667_s4 + $0x30] sm:$0xff]  }
   0x6   :  { %186 = vperm.xlu0 %1197, %v40_v3   ;;  %174 = vperm.xlu1 %1195, %v37_v4   ;;  %v52_v12 = vld [vmem:[%s1668_s1] sm:$0xff]  ;;  %v1218_v18 = vld [vmem:[%s1667_s4 + $0x28] sm:$0xff]   ;;  %v43_v21 = vld [vmem:[%s1666_s0 + $0x38] sm:$0xff] }
   0x7   :  { %1081 = vmatprep.subr.bf16.mxu0 %v1213_v9  ;;  %v1217_v15 = vld [vmem:[%s1667_s4 + $0x20] sm:$0xff]   ;;  %v41_v19 = vld [vmem:[%s1666_s0 + $0x28] sm:$0xff]  ;;  %v1220_v22 = vld [vmem:[%s1667_s4 + $0x38] sm:$0xff]  }
   0x8   :  { %1082 = vmatpush3.bf16.msra.mxu0 %v1213_v9  ;;  %v56_v23 = vld [vmem:[%s1668_s1 + $0x20] sm:$0xff]  ;;  %v42_v24 = vld [vmem:[%s1666_s0 + $0x30] sm:$0xff]  ;;  %v47_v26 = vld [vmem:[%s1666_s0 + $0x58] sm:$0xff] }
   0x9   :  { %1083 = vmatprep.subr.bf16.mxu0 %v1214_v10  ;;  %v58_v25 = vld [vmem:[%s1668_s1 + $0x30] sm:$0xff]  ;;  %v57_v27 = vld [vmem:[%s1668_s1 + $0x28] sm:$0xff]  ;;  %v60_v28 = vld [vmem:[%s1668_s1 + $0x40] sm:$0xff] }
   0xa   :  { %202 = vperm.xlu0 %1197, %v1311_v5   ;;  %1196 = vset.pattern.permute.xlu1 %v1238_v7  ;;  %v59_v29 = vld [vmem:[%s1668_s1 + $0x38] sm:$0xff]  ;;  %v62_v30 = vld [vmem:[%s1668_s1 + $0x50] sm:$0xff]  ;;  %v45_v31 = vld [vmem:[%s1666_s0 + $0x48] sm:$0xff] }
   0xb   :  { %86 = vperm.xlu1 %1196, %v39_v6   ;;  %v51_v32 = vld [vmem:[%s1666_s0 + $0x78] sm:$0xff]  ;;  %v64_v33 = vld [vmem:[%s1668_s1 + $0x60] sm:$0xff]  ;;  %v46_v34 = vld [vmem:[%s1666_s0 + $0x50] sm:$0xff] }
   0xc   :  { %1084 = vmatpush3.bf16.msra.mxu0 %v1214_v10  ;;  %v66_v35 = vld [vmem:[%s1668_s1 + $0x70] sm:$0xff]  ;;  %v61_v36 = vld [vmem:[%s1668_s1 + $0x48] sm:$0xff]  ;;  %v63_v37 = vld [vmem:[%s1668_s1 + $0x58] sm:$0xff] }
   0xd   :  { %1085 = vmatprep.subr.bf16.mxu0 %v1215_v11  ;;  %v49_v38 = vld [vmem:[%s1666_s0 + $0x68] sm:$0xff]  ;;  %v50_v39 = vld [vmem:[%s1666_s0 + $0x70] sm:$0xff]  ;;  %v67_v41 = vld [vmem:[%s1668_s1 + $0x78] sm:$0xff] }
   0xe   :  { %218 = vperm.xlu0 %1197, %v1321_v8   ;;  %v65_v40 = vld [vmem:[%s1668_s1 + $0x68] sm:$0xff]  ;;  %v1221_v47 = vld [vmem:[%s1669_s6] sm:$0xff]   ;;  %v1223_v52 = vld [vmem:[%s1669_s6 + $0x10] sm:$0xff]  }
   0xf   :  { %1198 = vset.pattern.permute.xlu1 %v1237_v0  ;;  %v1222_v49 = vld [vmem:[%s1669_s6 + $0x8] sm:$0xff]   ;;  %1113 = vmatprep.subr.bf16.mxu1 %v1221_v47  ;;  %v68_v57 = vld [vmem:[%s1670_s2] sm:$0x7]  ;;  %v1224_v58 = vld [vmem:[%s1669_s6 + $0x18] sm:$0xff]  }
  0x10   :  { %182 = vperm.xlu1 %1198, %v39_v6   ;;  %1086 = vmatpush3.bf16.msra.mxu0 %v1215_v11  ;;  %v1461_v61 = vrot.slane %v68_v57, %v235_v54  ;;  %v1463_v62 = vrot.slane %v68_v57, %v151_v55 }
  0x11   :  { %1087 = vmatprep.subr.bf16.mxu0 %v1216_v13  ;;  %1114 = vmatpush3.bf16.msra.mxu1 %v1221_v47 }
  0x12   :  { %1208 = vset.pattern.permute.xlu0 %v1238_v7  ;;  %1115 = vmatprep.subr.bf16.mxu1 %v1222_v49 }
  0x13   :  { %71 = vperm.xlu0 %1208, %v36_v2   ;;  %v1469_v2 = vrot.slane %v68_v57, %v351_v59 }
  0x14   :  { %1199 = vset.pattern.permute.xlu1 %v1238_v7  ;;  %1088 = vmatpush3.bf16.msra.mxu0 %v1216_v13 }
  0x15   :  { %271 = vperm.xlu1 %1199, %v52_v12   ;;  %1089 = vmatprep.subr.bf16.mxu0 %v1217_v15 }
  0x16   :  { %1116 = vmatpush3.bf16.msra.mxu1 %v1222_v49 }
  0x17   :  { %76 = vperm.xlu0 %1208, %v37_v4   ;;  %1117 = vmatprep.subr.bf16.mxu1 %v1223_v52 }
  0x18   :  { %1090 = vmatpush3.bf16.msra.mxu0 %v1217_v15 }
  0x19   :  { %281 = vperm.xlu1 %1199, %v54_v14   ;;  %1091 = vmatprep.subr.bf16.mxu0 %v1218_v18 }
  0x1a   :  { %1118 = vmatpush3.bf16.msra.mxu1 %v1223_v52 }
  0x1b   :  { %81 = vperm.xlu0 %1208, %v38_v1   ;;  %1119 = vmatprep.subr.bf16.mxu1 %v1224_v58 }
  0x1c   :  { %1092 = vmatpush3.bf16.msra.mxu0 %v1218_v18 }
  0x1d   :  { %286 = vperm.xlu1 %1199, %v55_v16   ;;  %1093 = vmatprep.subr.bf16.mxu0 %v1219_v20 }
  0x1e   :  { %1120 = vmatpush3.bf16.msra.mxu1 %v1224_v58 }
  0x1f   :  { %276 = vperm.xlu0 %1208, %v53_v17  }
  0x20   :  { %1094 = vmatpush3.bf16.msra.mxu0 %v1219_v20 }
  0x21   :  { %96 = vperm.xlu1 %1199, %v41_v19   ;;  %1095 = vmatprep.subr.bf16.mxu0 %v1220_v22 }
  0x23   :  { %91 = vperm.xlu0 %1208, %v40_v3  }
  0x24   :  { %1096 = vmatpush3.bf16.msra.mxu0 %v1220_v22  ;;  %v1487_v22 = vld [vmem:[%s1671_s3] ss:$0 sm:$0xff] }
  0x25   :  { %1200 = vset.pattern.permute.xlu1 %v1237_v0 }
  0x26   :  { %190 = vperm.xlu1 %1200, %v41_v19  }
  0x27   :  { %106 = vperm.xlu0 %1208, %v43_v21  }
  0x2a   :  { %1201 = vset.pattern.permute.xlu1 %v1238_v7 }
  0x2b   :  { %291 = vperm.xlu0 %1208, %v56_v23   ;;  %101 = vperm.xlu1 %1201, %v42_v24  }
  0x2f   :  { %301 = vperm.xlu0 %1208, %v58_v25   ;;  %1202 = vset.pattern.permute.xlu1 %v1237_v0 }
  0x30   :  { %194 = vperm.xlu1 %1202, %v42_v24  }
  0x33   :  { %111 = vperm.xlu0 %1208, %v1311_v5  }
  0x34   :  { %198 = vperm.xlu1 %1202, %v43_v21  }
  0x37   :  { %126 = vperm.xlu0 %1208, %v47_v26  }
  0x38   :  { %1203 = vset.pattern.permute.xlu1 %v1238_v7 }
  0x39   :  { %296 = vperm.xlu1 %1203, %v57_v27  }
  0x3b   :  { %311 = vperm.xlu0 %1208, %v60_v28  }
  0x3d   :  { %306 = vperm.xlu1 %1203, %v59_v29  }
  0x3f   :  { %321 = vperm.xlu0 %1208, %v62_v30  }
  0x41   :  { %116 = vperm.xlu1 %1203, %v45_v31  }
  0x43   :  { %131 = vperm.xlu0 %1208, %v1321_v8  }
  0x45   :  { %1204 = vset.pattern.permute.xlu1 %v1237_v0 }
  0x46   :  { %206 = vperm.xlu1 %1204, %v45_v31  }
  0x47   :  { %146 = vperm.xlu0 %1208, %v51_v32  }
  0x4a   :  { %1205 = vset.pattern.permute.xlu1 %v1238_v7 }
  0x4b   :  { %331 = vperm.xlu0 %1208, %v64_v33   ;;  %121 = vperm.xlu1 %1205, %v46_v34  }
  0x4f   :  { %341 = vperm.xlu0 %1208, %v66_v35   ;;  %1206 = vset.pattern.permute.xlu1 %v1237_v0 }
  0x50   :  { %210 = vperm.xlu1 %1206, %v46_v34  }
  0x54   :  { %214 = vperm.xlu1 %1206, %v47_v26  }
  0x58   :  { %1207 = vset.pattern.permute.xlu1 %v1238_v7 }
  0x59   :  { %316 = vperm.xlu1 %1207, %v61_v36  }
  0x5d   :  { %326 = vperm.xlu1 %1207, %v63_v37  }
  0x61   :  { %136 = vperm.xlu1 %1207, %v49_v38  }
  0x65   :  { %1209 = vset.pattern.permute.xlu1 %v1237_v0 }
  0x66   :  { %222 = vperm.xlu1 %1209, %v49_v38  }
  0x6a   :  { %1210 = vset.pattern.permute.xlu1 %v1238_v7 }
  0x6b   :  { %141 = vperm.xlu1 %1210, %v50_v39  }
  0x6f   :  { %1211 = vset.pattern.permute.xlu1 %v1237_v0  ;;  %v1225_v0 = vld [vmem:[%s1669_s6 + $0x20] sm:$0xff]  }
  0x70   :  { %226 = vperm.xlu1 %1211, %v50_v39   ;;  %1121 = vmatprep.subr.bf16.mxu1 %v1225_v0 }
  0x71   :  { %1122 = vmatpush3.bf16.msra.mxu1 %v1225_v0 }
  0x74   :  { %230 = vperm.xlu1 %1211, %v51_v32  }
  0x78   :  { %1212 = vset.pattern.permute.xlu1 %v1238_v7  ;;  %v1226_v7 = vld [vmem:[%s1669_s6 + $0x28] sm:$0xff]  }
  0x79   :  { %336 = vperm.xlu1 %1212, %v65_v40   ;;  %1123 = vmatprep.subr.bf16.mxu1 %v1226_v7 }
  0x7a   :  { %1124 = vmatpush3.bf16.msra.mxu1 %v1226_v7 }
  0x7d   :  { %346 = vperm.xlu1 %1212, %v67_v41  }
  0x81   :  { %v171_v42 = vpop.permute.xlu1 %170  ;;  %v179_v43 = vpop.permute.xlu0 %178 }
  0x82   :  { %v237_v4 = vmul.f32 %v1461_v61, %v171_v42  ;;  %v239_v8 = vmul.f32 %v1461_v61, %v179_v43 }
  0x85   :  { %v175_v44 = vpop.permute.xlu1 %174  ;;  %v1440_v45 = vpop.permute.xlu0 %186 }
  0x86   :  { %v238_v15 = vmul.f32 %v1461_v61, %v175_v44  ;;  %v241_v44 = vmul.f32 %v1461_v61, %v1440_v45 }
  0x89   :  { %v1445_v48 = vpop.permute.xlu0 %202 }
  0x8a   :  { %v87_v50 = vpop.permute.xlu1 %86 }
  0x8b   :  { %v156_v11 = vmul.f32 %v1463_v62, %v87_v50 }
  0x8d   :  { %v1453_v53 = vpop.permute.xlu0 %218 }
  0x8f   :  { %v183_v56 = vpop.permute.xlu1 %182 }
  0x90   :  { %v240_v5 = vmul.f32 %v1461_v61, %v183_v56 }
  0x92   :  { %v72_v60 = vpop.permute.xlu0 %71  ;;  %v256_v16 = vadd.f32 %v240_v5, %v156_v11 }
  0x93   :  { %v153_v1 = vmul.f32 %v1463_v62, %v72_v60 }
  0x94   :  { %v272_v63 = vpop.permute.xlu1 %271 }
  0x95   :  { %v253_v9 = vadd.f32 %v237_v4, %v153_v1  ;;  %v353_v10 = vmul.f32 %v1469_v2, %v272_v63 }
  0x96   :  { %v77_v3 = vpop.permute.xlu0 %76 }
  0x97   :  { %v154_v13 = vmul.f32 %v1463_v62, %v77_v3  ;;  %v369_v18 = vadd.f32 %v353_v10, %v253_v9 }
  0x98   :  { %v282_v6 = vpop.permute.xlu1 %281 }
  0x99   :  { %v355_v19 = vmul.f32 %v1469_v2, %v282_v6  ;;  %v254_v24 = vadd.f32 %v238_v15, %v154_v13  ;;  %v392_v31 = vadd.f32 %v1487_v22, %v369_v18 }
  0x9a   :  { %v82_v12 = vpop.permute.xlu0 %81 }
  0x9b   :  { %v155_v14 = vmul.f32 %v1463_v62, %v82_v12  ;;  %v408_v38 = vmax.f32 %v392_v31, 0.0 }
  0x9c   :  { %v287_v17 = vpop.permute.xlu1 %286 }
  0x9d   :  { %v255_v20 = vadd.f32 %v239_v8, %v155_v14  ;;  %v356_v21 = vmul.f32 %v1469_v2, %v287_v17 }
  0x9e   :  { %v277_v23 = vpop.permute.xlu0 %276 }
  0x9f   :  { %v371_v25 = vadd.f32 %v355_v19, %v255_v20  ;;  %v372_v26 = vadd.f32 %v356_v21, %v256_v16  ;;  %v354_v27 = vmul.f32 %v1469_v2, %v277_v23 }
  0xa0   :  { %v97_v28 = vpop.permute.xlu1 %96 }
  0xa1   :  { %v395_v29 = vadd.f32 %v1487_v22, %v372_v26  ;;  %v370_v30 = vadd.f32 %v354_v27, %v254_v24  ;;  %v394_v32 = vadd.f32 %v1487_v22, %v371_v25  ;;  %v158_v58 = vmul.f32 %v1463_v62, %v97_v28 }
  0xa2   :  { %v92_v35 = vpop.permute.xlu0 %91 }
  0xa3   :  { %v393_v33 = vadd.f32 %v1487_v22, %v370_v30  ;;  %v411_v34 = vmax.f32 %v395_v29, 0.0  ;;  %v410_v36 = vmax.f32 %v394_v32, 0.0  ;;  %v157_v46 = vmul.f32 %v1463_v62, %v92_v35 }
  0xa4   :  { %v245_v30 = vmul.f32 %v1461_v61, %v1445_v48 }
  0xa5   :  { %v191_v37 = vpop.permute.xlu1 %190  ;;  %v409_v39 = vmax.f32 %v393_v33, 0.0  ;;  %v425_v41 = vpack.c.bf16 %v411_v34, %v410_v36  ;;  %v257_v50 = vadd.f32 %v241_v44, %v157_v46 }
  0xa6   :  { %v107_v42 = vpop.permute.xlu0 %106  ;;  %v242_v55 = vmul.f32 %v1461_v61, %v191_v37 }
  0xa7   :  { %v424_v40 = vpack.c.bf16 %v409_v39, %v408_v38  ;;  %v160_v1 = vmul.f32 %v1463_v62, %v107_v42 }
  0xa8   :  { %v258_v0 = vadd.f32 %v242_v55, %v158_v58 }
  0xa9   :  { %1097 = vmatprep.mubr.bf16.mxu0 %v424_v40 }
  0xaa   :  { %1098 = vmatmul.mubr.bf16.vlgmr.msra.gmra.mrb[0].mxu0 %v425_v41  ;;  %v102_v43 = vpop.permute.xlu1 %101  ;;  %v292_v49 = vpop.permute.xlu0 %291 }
  0xab   :  { %v357_v51 = vmul.f32 %v1469_v2, %v292_v49  ;;  %v159_v56 = vmul.f32 %v1463_v62, %v102_v43 }
  0xad   :  { %v373_v59 = vadd.f32 %v357_v51, %v257_v50 }
  0xae   :  { %v302_v57 = vpop.permute.xlu0 %301 }
  0xaf   :  { %v195_v47 = vpop.permute.xlu1 %194  ;;  %v359_v45 = vmul.f32 %v1469_v2, %v302_v57  ;;  %v396_v5 = vadd.f32 %v1487_v22, %v373_v59 }
  0xb0   :  { %v243_v52 = vmul.f32 %v1461_v61, %v195_v47 }
  0xb1   :  { %v412_v12 = vmax.f32 %v396_v5, 0.0 }
  0xb2   :  { %v259_v60 = vadd.f32 %v243_v52, %v159_v56  ;;  %v112_v21 = vpop.permute.xlu0 %111 }
  0xb3   :  { %v199_v54 = vpop.permute.xlu1 %198  ;;  %v161_v29 = vmul.f32 %v1463_v62, %v112_v21 }
  0xb4   :  { %v244_v3 = vmul.f32 %v1461_v61, %v199_v54  ;;  %v375_v6 = vadd.f32 %v359_v45, %v259_v60 }
  0xb5   :  { %v261_v34 = vadd.f32 %v245_v30, %v161_v29 }
  0xb6   :  { %v260_v9 = vadd.f32 %v244_v3, %v160_v1  ;;  %v398_v15 = vadd.f32 %v1487_v22, %v375_v6  ;;  %v127_v25 = vpop.permute.xlu0 %126 }
  0xb7   :  { %v164_v46 = vmul.f32 %v1463_v62, %v127_v25 }
  0xb8   :  { %v297_v63 = vpop.permute.xlu1 %296  ;;  %v414_v20 = vmax.f32 %v398_v15, 0.0 }
  0xb9   :  { %v358_v4 = vmul.f32 %v1469_v2, %v297_v63 }
  0xba   :  { %v312_v28 = vpop.permute.xlu0 %311 }
  0xbb   :  { %v374_v7 = vadd.f32 %v358_v4, %v258_v0  ;;  %v361_v31 = vmul.f32 %v1469_v2, %v312_v28 }
  0xbc   :  { %v307_v8 = vpop.permute.xlu1 %306 }
  0xbd   :  { %v397_v10 = vadd.f32 %v1487_v22, %v374_v7  ;;  %v360_v11 = vmul.f32 %v1469_v2, %v307_v8  ;;  %v377_v37 = vadd.f32 %v361_v31, %v261_v34 }
  0xbe   :  { %v322_v40 = vpop.permute.xlu0 %321 }
  0xbf   :  { %v413_v13 = vmax.f32 %v397_v10, 0.0  ;;  %v376_v14 = vadd.f32 %v360_v11, %v260_v9  ;;  %v363_v42 = vmul.f32 %v1469_v2, %v322_v40  ;;  %v400_v47 = vadd.f32 %v1487_v22, %v377_v37  ;;  %v1228_v40 = vld [vmem:[%s1669_s6 + $0x38] sm:$0xff]  }
  0xc0   :  { %v117_v16 = vpop.permute.xlu1 %116  ;;  %v249_v11 = vmul.f32 %v1461_v61, %v1453_v53 }
  0xc1   :  { %v399_v17 = vadd.f32 %v1487_v22, %v376_v14  ;;  %v426_v18 = vpack.c.bf16 %v413_v13, %v412_v12  ;;  %v162_v38 = vmul.f32 %v1463_v62, %v117_v16  ;;  %v416_v56 = vmax.f32 %v400_v47, 0.0  ;;  %v1234_v47 = vld [vmem:[%s1672_s8 + $0x28] sm:$0xff]  }
  0xc2   :  { %v132_v3 = vpop.permute.xlu0 %131 }
  0xc3   :  { %v415_v19 = vmax.f32 %v399_v17, 0.0  ;;  %1101 = vmatprep.mubr.bf16.mxu0 %v426_v18  ;;  %v165_v10 = vmul.f32 %v1463_v62, %v132_v3 }
  0xc5   :  { %v207_v23 = vpop.permute.xlu1 %206  ;;  %v427_v24 = vpack.c.bf16 %v415_v19, %v414_v20  ;;  %v265_v15 = vadd.f32 %v249_v11, %v165_v10 }
  0xc6   :  { %v246_v35 = vmul.f32 %v1461_v61, %v207_v23  ;;  %v147_v6 = vpop.permute.xlu0 %146 }
  0xc7   :  { %1102 = vmatmul.mubr.bf16.gmra.mrb[4].mxu0 %v427_v24 }
  0xc8   :  { %v262_v43 = vadd.f32 %v246_v35, %v162_v38  ;;  %v1227_v35 = vld [vmem:[%s1669_s6 + $0x30] sm:$0xff]  }
  0xc9   :  { %1125 = vmatprep.subr.bf16.mxu1 %v1227_v35 }
  0xca   :  { %v122_v26 = vpop.permute.xlu1 %121  ;;  %v332_v9 = vpop.permute.xlu0 %331  ;;  %1126 = vmatpush3.bf16.msra.mxu1 %v1227_v35 }
  0xcb   :  { %v163_v36 = vmul.f32 %v1463_v62, %v122_v26  ;;  %v365_v12 = vmul.f32 %v1469_v2, %v332_v9  ;;  %1127 = vmatprep.subr.bf16.mxu1 %v1228_v40 }
  0xcd   :  { %v381_v19 = vadd.f32 %v365_v12, %v265_v15 }
  0xce   :  { %v342_v18 = vpop.permute.xlu0 %341  ;;  %1128 = vmatpush3.bf16.msra.mxu1 %v1228_v40 }
  0xcf   :  { %v211_v27 = vpop.permute.xlu1 %210  ;;  %v367_v24 = vmul.f32 %v1469_v2, %v342_v18  ;;  %v404_v28 = vadd.f32 %v1487_v22, %v381_v19 }
  0xd0   :  { %v247_v32 = vmul.f32 %v1461_v61, %v211_v27  ;;  %v168_v27 = vmul.f32 %v1463_v62, %v147_v6 }
  0xd2   :  { %v263_v39 = vadd.f32 %v247_v32, %v163_v36  ;;  %v420_v36 = vmax.f32 %v404_v28, 0.0 }
  0xd3   :  { %v215_v33 = vpop.permute.xlu1 %214 }
  0xd4   :  { %v248_v48 = vmul.f32 %v1461_v61, %v215_v33  ;;  %v379_v49 = vadd.f32 %v363_v42, %v263_v39 }
  0xd6   :  { %v264_v52 = vadd.f32 %v248_v48, %v164_v46  ;;  %v402_v59 = vadd.f32 %v1487_v22, %v379_v49  ;;  %v1231_v48 = vld [vmem:[%s1672_s8 + $0x10] sm:$0xff]   ;;  %v1233_v46 = vld [vmem:[%s1672_s8 + $0x20] sm:$0xff]  }
  0xd7   :  { %v1572_v49 = vld [vmem:[%s1673_s5] ss:$0 sm:$0xff] }
  0xd8   :  { %v317_v41 = vpop.permute.xlu1 %316  ;;  %v418_v1 = vmax.f32 %v402_v59, 0.0 }
  0xd9   :  { %v362_v44 = vmul.f32 %v1469_v2, %v317_v41 }
  0xdb   :  { %v378_v50 = vadd.f32 %v362_v44, %v262_v43  ;;  %v1229_v43 = vld [vmem:[%s1672_s8] sm:$0xff]   ;;  %v1232_v44 = vld [vmem:[%s1672_s8 + $0x18] sm:$0xff]  }
  0xdc   :  { %v327_v51 = vpop.permute.xlu1 %326  ;;  %1145 = vmatprep.subr.bf16.mxu0 %v1229_v43  ;;  %1177 = vmatprep.subr.bf16.mxu1 %v1229_v43 }
  0xdd   :  { %v401_v54 = vadd.f32 %v1487_v22, %v378_v50  ;;  %v364_v55 = vmul.f32 %v1469_v2, %v327_v51  ;;  %1146 = vmatpush3.bf16.msra.mxu0 %v1229_v43 }
  0xdf   :  { %v417_v57 = vmax.f32 %v401_v54, 0.0  ;;  %v380_v58 = vadd.f32 %v364_v55, %v264_v52 }
  0xe0   :  { %v137_v45 = vpop.permute.xlu1 %136 }
  0xe1   :  { %v403_v60 = vadd.f32 %v1487_v22, %v380_v58  ;;  %v428_v63 = vpack.c.bf16 %v417_v57, %v416_v56  ;;  %v166_v20 = vmul.f32 %v1463_v62, %v137_v45 }
  0xe3   :  { %v419_v0 = vmax.f32 %v403_v60, 0.0  ;;  %1105 = vmatprep.mubr.bf16.mxu0 %v428_v63 }
  0xe5   :  { %v223_v4 = vpop.permute.xlu1 %222  ;;  %v429_v5 = vpack.c.bf16 %v419_v0, %v418_v1 }
  0xe6   :  { %v250_v16 = vmul.f32 %v1461_v61, %v223_v4 }
  0xe7   :  { %1106 = vmatmul.mubr.bf16.gmra.mrb[8].mxu0 %v429_v5 }
  0xe8   :  { %v266_v25 = vadd.f32 %v250_v16, %v166_v20 }
  0xea   :  { %v142_v7 = vpop.permute.xlu1 %141 }
  0xeb   :  { %v167_v17 = vmul.f32 %v1463_v62, %v142_v7 }
  0xef   :  { %v227_v8 = vpop.permute.xlu1 %226 }
  0xf0   :  { %v251_v13 = vmul.f32 %v1461_v61, %v227_v8 }
  0xf2   :  { %v267_v21 = vadd.f32 %v251_v13, %v167_v17 }
  0xf3   :  { %v231_v14 = vpop.permute.xlu1 %230 }
  0xf4   :  { %v252_v53 = vmul.f32 %v1461_v61, %v231_v14  ;;  %v383_v29 = vadd.f32 %v367_v24, %v267_v21 }
  0xf6   :  { %v268_v32 = vadd.f32 %v252_v53, %v168_v27  ;;  %v406_v38 = vadd.f32 %v1487_v22, %v383_v29 }
  0xf8   :  { %v337_v23 = vpop.permute.xlu1 %336 }
  0xf9   :  { %v366_v26 = vmul.f32 %v1469_v2, %v337_v23 }
  0xfb   :  { %v382_v30 = vadd.f32 %v366_v26, %v266_v25 }
  0xfc   :  { %v347_v31 = vpop.permute.xlu1 %346 }
  0xfd   :  { %v405_v33 = vadd.f32 %v1487_v22, %v382_v30  ;;  %v368_v34 = vmul.f32 %v1469_v2, %v347_v31  ;;  %v422_v2 = vmax.f32 %v406_v38, 0.0 }
  0xff   :  { %v421_v61 = vmax.f32 %v405_v33, 0.0  ;;  %v384_v37 = vadd.f32 %v368_v34, %v268_v32 }
 0x101   :  { %v407_v62 = vadd.f32 %v1487_v22, %v384_v37  ;;  %v430_v39 = vpack.c.bf16 %v421_v61, %v420_v36  ;;  %v1230_v22 = vld [vmem:[%s1672_s8 + $0x8] sm:$0xff]   ;;  %v1235_v36 = vld [vmem:[%s1672_s8 + $0x30] sm:$0xff]  }
 0x102   :  { %1147 = vmatprep.subr.bf16.mxu0 %v1230_v22 }
 0x103   :  { %v423_v41 = vmax.f32 %v407_v62, 0.0  ;;  %1109 = vmatprep.mubr.bf16.mxu0 %v430_v39  ;;  %1148 = vmatpush3.bf16.msra.mxu0 %v1230_v22 }
 0x104   :  { %1149 = vmatprep.subr.bf16.mxu0 %v1231_v48 }
 0x105   :  { %v431_v42 = vpack.c.bf16 %v423_v41, %v422_v2  ;;  %v1236_v2 = vld [vmem:[%s1672_s8 + $0x38] sm:$0xff]  }
 0x107   :  { %1110 = vmatmul.mubr.bf16.gmra.mrb[12].mxu0 %v431_v42 }
 0x108   :  { %1150 = vmatpush3.bf16.msra.mxu0 %v1231_v48 }
 0x109   :  { %1151 = vmatprep.subr.bf16.mxu0 %v1232_v44 }
 0x10c   :  { %1152 = vmatpush3.bf16.msra.mxu0 %v1232_v44 }
 0x10d   :  { %1153 = vmatprep.subr.bf16.mxu0 %v1233_v46 }
 0x110   :  { %1154 = vmatpush3.bf16.msra.mxu0 %v1233_v46 }
 0x111   :  { %1155 = vmatprep.subr.bf16.mxu0 %v1234_v47 }
 0x114   :  { %1156 = vmatpush3.bf16.msra.mxu0 %v1234_v47 }
 0x115   :  { %1157 = vmatprep.subr.bf16.mxu0 %v1235_v36 }
 0x118   :  { %1158 = vmatpush3.bf16.msra.mxu0 %v1235_v36 }
 0x119   :  { %1159 = vmatprep.subr.bf16.mxu0 %v1236_v2 }
 0x11c   :  { %1160 = vmatpush3.bf16.msra.mxu0 %v1236_v2 }
 0x17d   :  { %v1099_v50 = vpop.f32.mrb[0].mxu0 }
 0x17e   :  { %v546_v51 = vadd.f32 %v1099_v50, %v1572_v49  ;;  %v537_v52 = vpop.f32.mrb[1].mxu0 }
 0x17f   :  { %v538_v54 = vadd.f32 %v1572_v49, %v537_v52  ;;  %v1100_v55 = vpop.f32.mrb[2].mxu0 }
 0x180   :  { %v549_v56 = vadd.f32 %v1100_v55, %v1572_v49  ;;  %v540_v57 = vpop.f32.mrb[3].mxu0  ;;  %v602_v59 = vmax.f32 %v546_v51, 0.0 }
 0x181   :  { %v541_v58 = vadd.f32 %v1572_v49, %v540_v57  ;;  %v600_v60 = vmax.f32 %v538_v54, 0.0 }
 0x182   :  { %v603_v45 = vmax.f32 %v549_v56, 0.0 }
 0x183   :  { %v601_v63 = vmax.f32 %v541_v58, 0.0 }
 0x184   :  { %v617_v0 = vpack.c.bf16 %v603_v45, %v602_v59 }
 0x185   :  { %v616_v1 = vpack.c.bf16 %v601_v63, %v600_v60 }
 0x187   :  { %1129 = vmatprep.mubr.bf16.mxu1 %v616_v1 }
 0x188   :  { %1130 = vmatmul.mubr.bf16.vlgmr.msra.gmra.mrb[0].mxu1 %v617_v0 }
 0x189   :  { %1185 = vmatpush3.bf16.msra.mxu1 %v1229_v43 }
 0x18a   :  { %1178 = vmatprep.subr.bf16.mxu1 %v1230_v22 }
 0x18d   :  { %1186 = vmatpush3.bf16.msra.mxu1 %v1230_v22  ;;  %v1015_v22 = vld [vmem:[%s1674_s7] ss:$0 sm:$0xff] }
 0x18e   :  { %1179 = vmatprep.subr.bf16.mxu1 %v1231_v48 }
 0x191   :  { %1187 = vmatpush3.bf16.msra.mxu1 %v1231_v48 }
 0x192   :  { %1180 = vmatprep.subr.bf16.mxu1 %v1232_v44 }
 0x195   :  { %1188 = vmatpush3.bf16.msra.mxu1 %v1232_v44 }
 0x196   :  { %1181 = vmatprep.subr.bf16.mxu1 %v1233_v46 }
 0x199   :  { %1189 = vmatpush3.bf16.msra.mxu1 %v1233_v46 }
 0x19a   :  { %v1103_v3 = vpop.f32.mrb[4].mxu0  ;;  %1182 = vmatprep.subr.bf16.mxu1 %v1234_v47 }
 0x19b   :  { %v562_v4 = vadd.f32 %v1103_v3, %v1572_v49  ;;  %v553_v5 = vpop.f32.mrb[5].mxu0 }
 0x19c   :  { %v554_v6 = vadd.f32 %v1572_v49, %v553_v5  ;;  %v1104_v7 = vpop.f32.mrb[6].mxu0 }
 0x19d   :  { %v565_v8 = vadd.f32 %v1104_v7, %v1572_v49  ;;  %v556_v9 = vpop.f32.mrb[7].mxu0  ;;  %1190 = vmatpush3.bf16.msra.mxu1 %v1234_v47  ;;  %v606_v11 = vmax.f32 %v562_v4, 0.0 }
 0x19e   :  { %v557_v10 = vadd.f32 %v1572_v49, %v556_v9  ;;  %v604_v13 = vmax.f32 %v554_v6, 0.0  ;;  %1183 = vmatprep.subr.bf16.mxu1 %v1235_v36 }
 0x19f   :  { %v607_v12 = vmax.f32 %v565_v8, 0.0 }
 0x1a0   :  { %v605_v14 = vmax.f32 %v557_v10, 0.0 }
 0x1a1   :  { %v619_v15 = vpack.c.bf16 %v607_v12, %v606_v11  ;;  %1191 = vmatpush3.bf16.msra.mxu1 %v1235_v36 }
 0x1a2   :  { %v618_v16 = vpack.c.bf16 %v605_v14, %v604_v13  ;;  %1184 = vmatprep.subr.bf16.mxu1 %v1236_v2 }
 0x1a4   :  { %1133 = vmatprep.mubr.bf16.mxu1 %v618_v16 }
 0x1a5   :  { %1134 = vmatmul.mubr.bf16.gmra.mrb[4].mxu1 %v619_v15 }
 0x1a6   :  { %1192 = vmatpush3.bf16.msra.mxu1 %v1236_v2 }
 0x1ba   :  { %v1107_v17 = vpop.f32.mrb[8].mxu0 }
 0x1bb   :  { %v578_v18 = vadd.f32 %v1107_v17, %v1572_v49  ;;  %v569_v19 = vpop.f32.mrb[9].mxu0 }
 0x1bc   :  { %v570_v20 = vadd.f32 %v1572_v49, %v569_v19  ;;  %v1108_v21 = vpop.f32.mrb[10].mxu0 }
 0x1bd   :  { %v581_v23 = vadd.f32 %v1108_v21, %v1572_v49  ;;  %v572_v24 = vpop.f32.mrb[11].mxu0  ;;  %v610_v53 = vmax.f32 %v578_v18, 0.0 }
 0x1be   :  { %v573_v25 = vadd.f32 %v1572_v49, %v572_v24  ;;  %v608_v27 = vmax.f32 %v570_v20, 0.0 }
 0x1bf   :  { %v611_v26 = vmax.f32 %v581_v23, 0.0 }
 0x1c0   :  { %v609_v28 = vmax.f32 %v573_v25, 0.0 }
 0x1c1   :  { %v621_v29 = vpack.c.bf16 %v611_v26, %v610_v53 }
 0x1c2   :  { %v620_v30 = vpack.c.bf16 %v609_v28, %v608_v27 }
 0x1c4   :  { %1137 = vmatprep.mubr.bf16.mxu1 %v620_v30 }
 0x1c5   :  { %1138 = vmatmul.mubr.bf16.gmra.mrb[8].mxu1 %v621_v29 }
 0x1da   :  { %v1111_v31 = vpop.f32.mrb[12].mxu0 }
 0x1db   :  { %v594_v32 = vadd.f32 %v1111_v31, %v1572_v49  ;;  %v585_v33 = vpop.f32.mrb[13].mxu0 }
 0x1dc   :  { %v586_v34 = vadd.f32 %v1572_v49, %v585_v33  ;;  %v1112_v35 = vpop.f32.mrb[14].mxu0 }
 0x1dd   :  { %v597_v61 = vadd.f32 %v1112_v35, %v1572_v49  ;;  %v588_v37 = vpop.f32.mrb[15].mxu0  ;;  %v614_v62 = vmax.f32 %v594_v32, 0.0 }
 0x1de   :  { %v589_v38 = vadd.f32 %v1572_v49, %v588_v37  ;;  %v612_v40 = vmax.f32 %v586_v34, 0.0 }
 0x1df   :  { %v615_v39 = vmax.f32 %v597_v61, 0.0 }
 0x1e0   :  { %v613_v41 = vmax.f32 %v589_v38, 0.0 }
 0x1e1   :  { %v623_v42 = vpack.c.bf16 %v615_v39, %v614_v62  ;;  %v1024_v62 = vld [vmem:[%s1675_s9] ss:$0 sm:$0xff] }
 0x1e2   :  { %v622_v43 = vpack.c.bf16 %v613_v41, %v612_v40 }
 0x1e4   :  { %1141 = vmatprep.mubr.bf16.mxu1 %v622_v43 }
 0x1e5   :  { %1142 = vmatmul.mubr.bf16.gmra.mrb[12].mxu1 %v623_v42 }
 0x25b   :  { %v1131_v48 = vpop.f32.mrb[0].mxu1 }
 0x25c   :  { %v738_v44 = vadd.f32 %v1131_v48, %v1015_v22  ;;  %v729_v46 = vpop.f32.mrb[1].mxu1 }
 0x25d   :  { %v730_v47 = vadd.f32 %v1015_v22, %v729_v46  ;;  %v1132_v49 = vpop.f32.mrb[2].mxu1 }
 0x25e   :  { %v741_v50 = vadd.f32 %v1132_v49, %v1015_v22  ;;  %v732_v51 = vpop.f32.mrb[3].mxu1  ;;  %v794_v54 = vmax.f32 %v738_v44, 0.0 }
 0x25f   :  { %v733_v52 = vadd.f32 %v1015_v22, %v732_v51  ;;  %v792_v56 = vmax.f32 %v730_v47, 0.0 }
 0x260   :  { %v795_v55 = vmax.f32 %v741_v50, 0.0 }
 0x261   :  { %v793_v57 = vmax.f32 %v733_v52, 0.0 }
 0x262   :  { %v809_v58 = vpack.c.bf16 %v795_v55, %v794_v54 }
 0x263   :  { %v808_v59 = vpack.c.bf16 %v793_v57, %v792_v56 }
 0x265   :  { %1161 = vmatprep.mubr.bf16.mxu0 %v808_v59 }
 0x266   :  { %1162 = vmatmul.mubr.bf16.vlgmr.msra.gmra.mrb[16].mxu0 %v809_v58 }
 0x278   :  { %v1135_v45 = vpop.f32.mrb[4].mxu1 }
 0x279   :  { %v754_v60 = vadd.f32 %v1135_v45, %v1015_v22  ;;  %v745_v63 = vpop.f32.mrb[5].mxu1 }
 0x27a   :  { %v746_v0 = vadd.f32 %v1015_v22, %v745_v63  ;;  %v1136_v1 = vpop.f32.mrb[6].mxu1 }
 0x27b   :  { %v757_v3 = vadd.f32 %v1136_v1, %v1015_v22  ;;  %v748_v4 = vpop.f32.mrb[7].mxu1  ;;  %v798_v6 = vmax.f32 %v754_v60, 0.0 }
 0x27c   :  { %v749_v5 = vadd.f32 %v1015_v22, %v748_v4  ;;  %v796_v8 = vmax.f32 %v746_v0, 0.0 }
 0x27d   :  { %v799_v7 = vmax.f32 %v757_v3, 0.0 }
 0x27e   :  { %v797_v9 = vmax.f32 %v749_v5, 0.0 }
 0x27f   :  { %v811_v10 = vpack.c.bf16 %v799_v7, %v798_v6 }
 0x280   :  { %v810_v11 = vpack.c.bf16 %v797_v9, %v796_v8 }
 0x282   :  { %1165 = vmatprep.mubr.bf16.mxu0 %v810_v11 }
 0x283   :  { %1166 = vmatmul.mubr.bf16.gmra.mrb[20].mxu0 %v811_v10 }
 0x298   :  { %v1139_v12 = vpop.f32.mrb[8].mxu1 }
 0x299   :  { %v770_v13 = vadd.f32 %v1139_v12, %v1015_v22  ;;  %v761_v14 = vpop.f32.mrb[9].mxu1 }
 0x29a   :  { %v762_v15 = vadd.f32 %v1015_v22, %v761_v14  ;;  %v1140_v16 = vpop.f32.mrb[10].mxu1 }
 0x29b   :  { %v773_v17 = vadd.f32 %v1140_v16, %v1015_v22  ;;  %v764_v18 = vpop.f32.mrb[11].mxu1  ;;  %v802_v20 = vmax.f32 %v770_v13, 0.0 }
 0x29c   :  { %v765_v19 = vadd.f32 %v1015_v22, %v764_v18  ;;  %v800_v23 = vmax.f32 %v762_v15, 0.0 }
 0x29d   :  { %v803_v21 = vmax.f32 %v773_v17, 0.0 }
 0x29e   :  { %v801_v24 = vmax.f32 %v765_v19, 0.0 }
 0x29f   :  { %v813_v25 = vpack.c.bf16 %v803_v21, %v802_v20 }
 0x2a0   :  { %v812_v53 = vpack.c.bf16 %v801_v24, %v800_v23 }
 0x2a2   :  { %1169 = vmatprep.mubr.bf16.mxu1 %v812_v53 }
 0x2a3   :  { %1170 = vmatmul.mubr.bf16.vlgmr.msra.gmra.mrb[16].mxu1 %v813_v25 }
 0x2b8   :  { %v1143_v26 = vpop.f32.mrb[12].mxu1 }
 0x2b9   :  { %v786_v27 = vadd.f32 %v1143_v26, %v1015_v22  ;;  %v777_v28 = vpop.f32.mrb[13].mxu1 }
 0x2ba   :  { %v778_v29 = vadd.f32 %v1015_v22, %v777_v28  ;;  %v1144_v30 = vpop.f32.mrb[14].mxu1 }
 0x2bb   :  { %v789_v31 = vadd.f32 %v1144_v30, %v1015_v22  ;;  %v780_v32 = vpop.f32.mrb[15].mxu1  ;;  %v806_v34 = vmax.f32 %v786_v27, 0.0 }
 0x2bc   :  { %v781_v33 = vadd.f32 %v1015_v22, %v780_v32  ;;  %v804_v36 = vmax.f32 %v778_v29, 0.0 }
 0x2bd   :  { %v807_v35 = vmax.f32 %v789_v31, 0.0 }
 0x2be   :  { %v805_v61 = vmax.f32 %v781_v33, 0.0 }
 0x2bf   :  { %v815_v37 = vpack.c.bf16 %v807_v35, %v806_v34 }
 0x2c0   :  { %v814_v38 = vpack.c.bf16 %v805_v61, %v804_v36 }
 0x2c2   :  { %1173 = vmatprep.mubr.bf16.mxu1 %v814_v38 }
 0x2c3   :  { %1174 = vmatmul.mubr.bf16.gmra.mrb[20].mxu1 %v815_v37 }
 0x339   :  { %v1163_v39 = vpop.f32.mrb[16].mxu0 }
 0x33a   :  { %v930_v40 = vadd.f32 %v1163_v39, %v1024_v62  ;;  %v921_v41 = vpop.f32.mrb[17].mxu0 }
 0x33b   :  { %v922_v2 = vadd.f32 %v1024_v62, %v921_v41  ;;  %v1164_v42 = vpop.f32.mrb[18].mxu0 }
 0x33c   :  { %987 = vst.msk [vmem:[%s1676_s10 + $0x10] sm:$0xff] %vm984_vm0, %v930_v40  ;;  %v933_v43 = vadd.f32 %v1164_v42, %v1024_v62  ;;  %v924_v22 = vpop.f32.mrb[19].mxu0 }
 0x33d   :  { %985 = vst.msk [vmem:[%s1676_s10] sm:$0xff] %vm984_vm0, %v922_v2  ;;  %v925_v48 = vadd.f32 %v1024_v62, %v924_v22 }
 0x33e   :  { %988 = vst.msk [vmem:[%s1676_s10 + $0x18] sm:$0xff] %vm984_vm0, %v933_v43 }
 0x33f   :  { %986 = vst.msk [vmem:[%s1676_s10 + $0x8] sm:$0xff] %vm984_vm0, %v925_v48 }
 0x356   :  { %v1167_v44 = vpop.f32.mrb[20].mxu0 }
 0x357   :  { %v946_v46 = vadd.f32 %v1167_v44, %v1024_v62  ;;  %v937_v47 = vpop.f32.mrb[21].mxu0 }
 0x358   :  { %v938_v49 = vadd.f32 %v1024_v62, %v937_v47  ;;  %v1168_v50 = vpop.f32.mrb[22].mxu0 }
 0x359   :  { %991 = vst.msk [vmem:[%s1676_s10 + $0x30] sm:$0xff] %vm984_vm0, %v946_v46  ;;  %v949_v51 = vadd.f32 %v1168_v50, %v1024_v62  ;;  %v940_v52 = vpop.f32.mrb[23].mxu0 }
 0x35a   :  { %989 = vst.msk [vmem:[%s1676_s10 + $0x20] sm:$0xff] %vm984_vm0, %v938_v49  ;;  %v941_v54 = vadd.f32 %v1024_v62, %v940_v52 }
 0x35b   :  { %992 = vst.msk [vmem:[%s1676_s10 + $0x38] sm:$0xff] %vm984_vm0, %v949_v51 }
 0x35c   :  { %990 = vst.msk [vmem:[%s1676_s10 + $0x28] sm:$0xff] %vm984_vm0, %v941_v54 }
 0x376   :  { %v1171_v55 = vpop.f32.mrb[16].mxu1 }
 0x377   :  { %v962_v56 = vadd.f32 %v1171_v55, %v1024_v62  ;;  %v953_v57 = vpop.f32.mrb[17].mxu1 }
 0x378   :  { %v954_v58 = vadd.f32 %v1024_v62, %v953_v57  ;;  %v1172_v59 = vpop.f32.mrb[18].mxu1 }
 0x379   :  { %995 = vst.msk [vmem:[%s1676_s10 + $0x50] sm:$0xff] %vm984_vm0, %v962_v56  ;;  %v965_v45 = vadd.f32 %v1172_v59, %v1024_v62  ;;  %v956_v60 = vpop.f32.mrb[19].mxu1 }
 0x37a   :  { %993 = vst.msk [vmem:[%s1676_s10 + $0x40] sm:$0xff] %vm984_vm0, %v954_v58  ;;  %v957_v63 = vadd.f32 %v1024_v62, %v956_v60 }
 0x37b   :  { %996 = vst.msk [vmem:[%s1676_s10 + $0x58] sm:$0xff] %vm984_vm0, %v965_v45 }
 0x37c   :  { %994 = vst.msk [vmem:[%s1676_s10 + $0x48] sm:$0xff] %vm984_vm0, %v957_v63 }
 0x396   :  { %v1175_v0 = vpop.f32.mrb[20].mxu1 }
 0x397   :  { %v978_v1 = vadd.f32 %v1175_v0, %v1024_v62  ;;  %v969_v3 = vpop.f32.mrb[21].mxu1 }
 0x398   :  { %v970_v4 = vadd.f32 %v1024_v62, %v969_v3  ;;  %v1176_v5 = vpop.f32.mrb[22].mxu1 }
 0x399   :  { %999 = vst.msk [vmem:[%s1676_s10 + $0x70] sm:$0xff] %vm984_vm0, %v978_v1  ;;  %v981_v6 = vadd.f32 %v1176_v5, %v1024_v62  ;;  %v972_v7 = vpop.f32.mrb[23].mxu1 }
 0x39a   :  { %997 = vst.msk [vmem:[%s1676_s10 + $0x60] sm:$0xff] %vm984_vm0, %v970_v4  ;;  %v973_v8 = vadd.f32 %v1024_v62, %v972_v7 }
 0x39b   :  { %1000 = vst.msk [vmem:[%s1676_s10 + $0x78] sm:$0xff] %vm984_vm0, %v981_v6 }
 0x39c   :  { %998 = vst.msk [vmem:[%s1676_s10 + $0x68] sm:$0xff] %vm984_vm0, %v973_v8 }

</bundles_post_ra>
